<compile_context>
chip_gen: v5e
topology: v5e:2x2
jax: 0.10.0
libtpu: 0.0.40
codegen_flags: <defaults>
</compile_context>

<pallas_src>
import functools
import math

import jax
import jax.numpy as jnp
from jax.experimental import pallas as pl
from jax.experimental.pallas import tpu as pltpu


# ----------------------------- Pallas kernel -------------------------------

def _attention_kernel(vl_ref, q_ref, k_ref, v_ref, wq_ref, wk_ref, wv_ref,
                      out_ref, attn_ref, *, scale):
    """Fused attention for one block of BB batch rows.

    vl_ref   : (BB, Tq, 1)   int32  per-query valid key length
    q_ref    : (BB, Tq, Dq)  bf16
    k_ref    : (BB, Tk, Dk)  bf16   (Tk already padded to a multiple of 128)
    v_ref    : (BB, Tk, Dv)  bf16
    wq_ref   : (Dq, O)       bf16   (O padded to a multiple of 128)
    wk_ref   : (Dk, O)       bf16
    wv_ref   : (Dv, O)       bf16
    out_ref  : (BB, Tq, O)   f32
    attn_ref : (BB, Tq, Tk)  f32 (or bf16)  -- module's self.attention_weights
    """
    bb, tq, dq = q_ref.shape
    _, tk, dk = k_ref.shape
    dv = v_ref.shape[-1]
    o = wq_ref.shape[-1]

    # --- Projections: flatten (BB, T, D) -> (BB*T, D) so the MXU sees a large
    #     M dimension.  bf16 operands, f32 accumulation.
    q = jnp.dot(q_ref[...].reshape(bb * tq, dq), wq_ref[...],
                preferred_element_type=jnp.float32).reshape(bb, tq, o)
    k = jnp.dot(k_ref[...].reshape(bb * tk, dk), wk_ref[...],
                preferred_element_type=jnp.float32).reshape(bb, tk, o)
    v = jnp.dot(v_ref[...].reshape(bb * tk, dv), wv_ref[...],
                preferred_element_type=jnp.float32).reshape(bb, tk, o)

    # --- scores = q @ k^T / sqrt(o_size); contraction on the feature axis
    #     (no explicit transpose), bf16 operands, f32 accumulation.
    scores = jnp.einsum("bqo,bko->bqk",
                        q.astype(jnp.bfloat16), k.astype(jnp.bfloat16),
                        preferred_element_type=jnp.float32)
    scores = scores * jnp.float32(scale)

    # --- masked_softmax: positions >= valid_len set to -1e6 (matches PyTorch).
    #     This also neutralizes the zero-padded key rows added by the wrapper.
    col_ids = jax.lax.broadcasted_iota(jnp.int32, scores.shape, 2)
    mask = col_ids < vl_ref[...]                      # (BB,Tq,Tk) < (BB,Tq,1)
    scores = jnp.where(mask, scores, jnp.float32(-1e6))

    # Numerically stable softmax (f32); divide goes to the EUP via reciprocal.
    m = jnp.max(scores, axis=-1, keepdims=True)
    e = jnp.exp(scores - m)
    s = jnp.sum(e, axis=-1, keepdims=True)
    attn = e * pl.reciprocal(s, approx=True)
    attn_ref[...] = attn.astype(attn_ref.dtype)

    # --- out = attn @ v  (dropout omitted; see TODO above).
    out = jnp.einsum("bqk,bko->bqo",
                     attn.astype(jnp.bfloat16), v.astype(jnp.bfloat16),
                     preferred_element_type=jnp.float32)
    out_ref[...] = out.astype(out_ref.dtype)


# ------------------------------ wrapper -------------------------------------

def _round_up(x, m):
    return ((x + m - 1) // m) * m


def _pad_axis(x, axis, new_size):
    pad = new_size - x.shape[axis]
    if pad <= 0:
        return x
    widths = [(0, 0)] * x.ndim
    widths[axis] = (0, pad)
    return jnp.pad(x, widths)


def _largest_divisor_leq(n, cap):
    cap = max(1, min(n, cap))
    for d in range(cap, 0, -1):
        if n % d == 0:
            return d
    return 1


def attention_forward(params, queries, keys, values, valid_lens=None, *,
                      attn_dtype=jnp.float32):
    """Equivalent of Attention.forward.

    queries : (B, Tq, q_size) f32
    keys    : (B, Tk, k_size) f32
    values  : (B, Tk, v_size) f32
    valid_lens : None | (B,) | (B, Tq) int
    returns (output (B, Tq, o_size) f32, attention_weights (B, Tq, Tk))

    attn_dtype=jnp.bfloat16 halves the (B,Tq,Tk) writeback (the dominant HBM
    traffic term at scale); kept f32 here for a strict reference check.
    """
    B, Tq, Dq = queries.shape
    _, Tk, Dk = keys.shape
    _, _, Dv = values.shape
    O = params["w_q"].shape[1]
    scale = 1.0 / math.sqrt(O)

    # Lane-dense padded sizes for everything that lands on the output lane axis.
    Tq_p = _round_up(Tq, 8)          # sublane alignment for the flattened view
    Tk_p = _round_up(Tk, 128)        # attn last dim -> unmasked vector stores
    O_p = _round_up(O, 128)          # out  last dim -> unmasked vector stores

    # Normalize valid_lens to per-(batch, query) int32, default = Tk (also masks
    # the zero-padded key rows beyond the original Tk).
    if valid_lens is None:
        vl = jnp.full((B, Tq), Tk, dtype=jnp.int32)
    elif valid_lens.ndim == 1:
        vl = jnp.broadcast_to(valid_lens.astype(jnp.int32)[:, None], (B, Tq))
    else:
        vl = valid_lens.astype(jnp.int32)
    vl = _pad_axis(vl, 1, Tq_p).reshape(B, Tq_p, 1)

    # Pad + cast inputs/weights to bf16 (MXU-native; halves DMA bytes).
    bf = jnp.bfloat16
    q_b = _pad_axis(queries, 1, Tq_p).astype(bf)
    k_b = _pad_axis(keys, 1, Tk_p).astype(bf)
    v_b = _pad_axis(values, 1, Tk_p).astype(bf)
    wq_b = _pad_axis(params["w_q"], 1, O_p).astype(bf)   # zero output columns
    wk_b = _pad_axis(params["w_k"], 1, O_p).astype(bf)
    wv_b = _pad_axis(params["w_v"], 1, O_p).astype(bf)

    # Batch blocking: BB rows per grid step, targeting ~256 effective MXU rows.
    BB = _largest_divisor_leq(B, max(1, 256 // Tq_p))
    grid = (B // BB,)

    kernel = functools.partial(_attention_kernel, scale=float(scale))

    out_p, attn_p = pl.pallas_call(
        kernel,
        out_shape=(
            jax.ShapeDtypeStruct((B, Tq_p, O_p), jnp.float32),
            jax.ShapeDtypeStruct((B, Tq_p, Tk_p), attn_dtype),
        ),
        grid=grid,
        in_specs=[
            pl.BlockSpec((BB, Tq_p, 1), lambda b: (b, 0, 0)),     # valid lens
            pl.BlockSpec((BB, Tq_p, Dq), lambda b: (b, 0, 0)),    # queries
            pl.BlockSpec((BB, Tk_p, Dk), lambda b: (b, 0, 0)),    # keys
            pl.BlockSpec((BB, Tk_p, Dv), lambda b: (b, 0, 0)),    # values
            pl.BlockSpec((Dq, O_p), lambda b: (0, 0)),            # W_q^T (resident)
            pl.BlockSpec((Dk, O_p), lambda b: (0, 0)),            # W_k^T
            pl.BlockSpec((Dv, O_p), lambda b: (0, 0)),            # W_v^T
        ],
        out_specs=(
            pl.BlockSpec((BB, Tq_p, O_p), lambda b: (b, 0, 0)),
            pl.BlockSpec((BB, Tq_p, Tk_p), lambda b: (b, 0, 0)),
        ),
        compiler_params=pltpu.CompilerParams(
            dimension_semantics=("parallel",),   # batch blocks are independent
            vmem_limit_bytes=64 * 1024 * 1024,   # explicit budget (v7x: 64 MiB)
        ),
    )(vl, q_b, k_b, v_b, wq_b, wk_b, wv_b)

    # Strip the lane/sublane padding back off.
    return out_p[:, :Tq, :O], attn_p[:, :Tq, :Tk].astype(jnp.float32)


# -------------------------- pure-JAX reference -------------------------------

def attention_reference(params, queries, keys, values, valid_lens=None):
    """Reference with the same bf16-operand / f32-accumulation matmul recipe."""
    bf, f32 = jnp.bfloat16, jnp.float32
    q = jnp.einsum("bqd,do->bqo", queries.astype(bf), params["w_q"].astype(bf),
                   preferred_element_type=f32)
    k = jnp.einsum("bkd,do->bko", keys.astype(bf), params["w_k"].astype(bf),
                   preferred_element_type=f32)
    v = jnp.einsum("bkd,do->bko", values.astype(bf), params["w_v"].astype(bf),
                   preferred_element_type=f32)
    d = q.shape[-1]
    scores = jnp.einsum("bqo,bko->bqk", q.astype(bf), k.astype(bf),
                        preferred_element_type=f32) / math.sqrt(d)
    if valid_lens is not None:
        vl = valid_lens[:, None] if valid_lens.ndim == 1 else valid_lens
        mask = jnp.arange(scores.shape[-1])[None, None, :] < vl[:, :, None]
        scores = jnp.where(mask, scores, -1e6)
    attn = jax.nn.softmax(scores, axis=-1)
    out = jnp.einsum("bqk,bko->bqo", attn.astype(bf), v.astype(bf),
                     preferred_element_type=f32)
    return out, attn


# ---------------------------------- main ------------------------------------

if __name__ == "__main__":
    batch, tq, tk = 2, 8, 16
    q_size, k_size, v_size, o_size = 16, 24, 40, 32

    root = jax.random.PRNGKey(0)
    kq, kk, kv, kwq, kwk, kwv = jax.random.split(root, 6)

    queries = jax.random.normal(kq, (batch, tq, q_size), jnp.float32)
    keys = jax.random.normal(kk, (batch, tk, k_size), jnp.float32)
    values = jax.random.normal(kv, (batch, tk, v_size), jnp.float32)
    valid_lens = jnp.array([5, 12], dtype=jnp.int32)

    def _uniform(key, shape, fan_in):
        bound = 1.0 / math.sqrt(fan_in)
        return jax.random.uniform(key, shape, jnp.float32, -bound, bound)

    # Weights stored transposed relative to torch (in_dim, o_size) so the kernel
    # computes x @ W directly.
    params = dict(
        w_q=_uniform(kwq, (q_size, o_size), q_size),
        w_k=_uniform(kwk, (k_size, o_size), k_size),
        w_v=_uniform(kwv, (v_size, o_size), v_size),
    )

    # Masked path.
    out, attn = attention_forward(params, queries, keys, values, valid_lens)
    jax.block_until_ready((out, attn))
    assert out.shape == (batch, tq, o_size)
    assert attn.shape == (batch, tq, tk)

    ref_out, ref_attn = attention_reference(params, queries, keys, values, valid_lens)
    # bf16 MXU operands + approximate reciprocal -> slightly relaxed tolerance.
    assert jnp.allclose(out, ref_out, atol=1e-2, rtol=1e-2)
    assert jnp.allclose(attn, ref_attn, atol=1e-2, rtol=1e-2)

    # valid_lens=None path (exercises the default-mask / key-padding handling).
    out2, attn2 = attention_forward(params, queries, keys, values, None)
    jax.block_until_ready((out2, attn2))
    ref_out2, ref_attn2 = attention_reference(params, queries, keys, values, None)
    assert jnp.allclose(out2, ref_out2, atol=1e-2, rtol=1e-2)
    assert jnp.allclose(attn2, ref_attn2, atol=1e-2, rtol=1e-2)

    print("KERNEL_OK")
</pallas_src>

<mosaic_0001>
module attributes {stable_mosaic.version = 11 : i64} {
  func.func @_attention_kernel(%arg0: i32, %arg1: memref<2x8x1xi32, #tpu.memory_space<vmem>>, %arg2: memref<2x8x16xbf16, #tpu.memory_space<vmem>>, %arg3: memref<2x128x24xbf16, #tpu.memory_space<vmem>>, %arg4: memref<2x128x40xbf16, #tpu.memory_space<vmem>>, %arg5: memref<16x128xbf16, #tpu.memory_space<vmem>>, %arg6: memref<24x128xbf16, #tpu.memory_space<vmem>>, %arg7: memref<40x128xbf16, #tpu.memory_space<vmem>>, %arg8: memref<2x8x128xf32, #tpu.memory_space<vmem>>, %arg9: memref<2x8x128xf32, #tpu.memory_space<vmem>>) attributes {dimension_semantics = [#tpu.dimension_semantics<parallel>], iteration_bounds = array<i64: 1>, scalar_prefetch = 0 : i64, scratch_operands = 0 : i64, tpu.core_type = #tpu.core_type<tc>, window_params = [{transform_indices = @transform_0, window_bounds = array<i64: 2, 8, 1>}, {transform_indices = @transform_1, window_bounds = array<i64: 2, 8, 16>}, {transform_indices = @transform_2, window_bounds = array<i64: 2, 128, 24>}, {transform_indices = @transform_3, window_bounds = array<i64: 2, 128, 40>}, {pipeline_mode = #tpu.pipeline_mode<synchronous>, transform_indices = @transform_4, window_bounds = array<i64: 16, 128>}, {pipeline_mode = #tpu.pipeline_mode<synchronous>, transform_indices = @transform_5, window_bounds = array<i64: 24, 128>}, {pipeline_mode = #tpu.pipeline_mode<synchronous>, transform_indices = @transform_6, window_bounds = array<i64: 40, 128>}, {transform_indices = @transform_7, window_bounds = array<i64: 2, 8, 128>}, {transform_indices = @transform_8, window_bounds = array<i64: 2, 8, 128>}]} {
    %c0 = arith.constant 0 : index
    %c0_0 = arith.constant 0 : index
    %c0_1 = arith.constant 0 : index
    %0 = vector.load %arg2[%c0, %c0_0, %c0_1] : memref<2x8x16xbf16, #tpu.memory_space<vmem>>, vector<2x8x16xbf16>
    %1 = vector.shape_cast %0 : vector<2x8x16xbf16> to vector<16x16xbf16>
    %c0_2 = arith.constant 0 : index
    %c0_3 = arith.constant 0 : index
    %2 = vector.load %arg5[%c0_2, %c0_3] : memref<16x128xbf16, #tpu.memory_space<vmem>>, vector<16x128xbf16>
    %cst = arith.constant dense<0.000000e+00> : vector<16x128xf32>
    %3 = tpu.matmul %1, %2, %cst {dimension_numbers = #tpu.dot_dimension_numbers<[1], [0], [0], [1], [0, 0, 1, 1], [], []>} : vector<16x16xbf16>, vector<16x128xbf16>, vector<16x128xf32> -> vector<16x128xf32>
    %4 = vector.shape_cast %3 : vector<16x128xf32> to vector<2x8x128xf32>
    %c0_4 = arith.constant 0 : index
    %c0_5 = arith.constant 0 : index
    %c0_6 = arith.constant 0 : index
    %5 = vector.load %arg3[%c0_4, %c0_5, %c0_6] : memref<2x128x24xbf16, #tpu.memory_space<vmem>>, vector<2x128x24xbf16>
    %6 = vector.shape_cast %5 : vector<2x128x24xbf16> to vector<256x24xbf16>
    %c0_7 = arith.constant 0 : index
    %c0_8 = arith.constant 0 : index
    %7 = vector.load %arg6[%c0_7, %c0_8] : memref<24x128xbf16, #tpu.memory_space<vmem>>, vector<24x128xbf16>
    %cst_9 = arith.constant dense<0.000000e+00> : vector<256x128xf32>
    %8 = tpu.matmul %6, %7, %cst_9 {dimension_numbers = #tpu.dot_dimension_numbers<[1], [0], [0], [1], [0, 0, 1, 1], [], []>} : vector<256x24xbf16>, vector<24x128xbf16>, vector<256x128xf32> -> vector<256x128xf32>
    %9 = vector.shape_cast %8 : vector<256x128xf32> to vector<2x128x128xf32>
    %c0_10 = arith.constant 0 : index
    %c0_11 = arith.constant 0 : index
    %c0_12 = arith.constant 0 : index
    %10 = vector.load %arg4[%c0_10, %c0_11, %c0_12] : memref<2x128x40xbf16, #tpu.memory_space<vmem>>, vector<2x128x40xbf16>
    %11 = vector.shape_cast %10 : vector<2x128x40xbf16> to vector<256x40xbf16>
    %c0_13 = arith.constant 0 : index
    %c0_14 = arith.constant 0 : index
    %12 = vector.load %arg7[%c0_13, %c0_14] : memref<40x128xbf16, #tpu.memory_space<vmem>>, vector<40x128xbf16>
    %cst_15 = arith.constant dense<0.000000e+00> : vector<256x128xf32>
    %13 = tpu.matmul %11, %12, %cst_15 {dimension_numbers = #tpu.dot_dimension_numbers<[1], [0], [0], [1], [0, 0, 1, 1], [], []>} : vector<256x40xbf16>, vector<40x128xbf16>, vector<256x128xf32> -> vector<256x128xf32>
    %14 = vector.shape_cast %13 : vector<256x128xf32> to vector<2x128x128xf32>
    %15 = arith.truncf %4 : vector<2x8x128xf32> to vector<2x8x128xbf16>
    %16 = arith.truncf %9 : vector<2x128x128xf32> to vector<2x128x128xbf16>
    "tpu.trace_start"() <{level = 10 : i32, message = "bqo,bko->bqk"}> : () -> ()
    %cst_16 = arith.constant dense<0.000000e+00> : vector<2x8x128xf32>
    %17 = tpu.matmul %15, %16, %cst_16 {dimension_numbers = #tpu.dot_dimension_numbers<[2], [2], [1], [1], [0, 0, 0, 1, 1, 1], [0], [0]>} : vector<2x8x128xbf16>, vector<2x128x128xbf16>, vector<2x8x128xf32> -> vector<2x8x128xf32>
    "tpu.trace_stop"() : () -> ()
    %cst_17 = arith.constant 0.176776692 : f32
    %18 = vector.broadcast %cst_17 : f32 to vector<2x8x128xf32>
    %19 = arith.mulf %17, %18 : vector<2x8x128xf32>
    %20 = tpu.iota {dimensions = array<i32: 2>} : vector<2x8x128xi32>
    %c0_18 = arith.constant 0 : index
    %c0_19 = arith.constant 0 : index
    %c0_20 = arith.constant 0 : index
    %21 = vector.load %arg1[%c0_18, %c0_19, %c0_20] : memref<2x8x1xi32, #tpu.memory_space<vmem>>, vector<2x8x1xi32>
    %22 = vector.broadcast %21 : vector<2x8x1xi32> to vector<2x8x128xi32>
    %23 = arith.cmpi slt, %20, %22 : vector<2x8x128xi32>
    %cst_21 = arith.constant -1.000000e+06 : f32
    %24 = vector.broadcast %cst_21 : f32 to vector<2x8x128xf32>
    %25 = arith.select %23, %19, %24 : vector<2x8x128xi1>, vector<2x8x128xf32>
    %cst_22 = arith.constant dense<0xFF800000> : vector<2x8xf32>
    %26 = vector.multi_reduction <maximumf>, %25, %cst_22 [2] : vector<2x8x128xf32> to vector<2x8xf32>
    %27 = vector.shape_cast %26 : vector<2x8xf32> to vector<2x8x1xf32>
    %28 = vector.broadcast %27 : vector<2x8x1xf32> to vector<2x8x128xf32>
    %29 = arith.subf %25, %28 : vector<2x8x128xf32>
    %30 = math.exp %29 : vector<2x8x128xf32>
    %cst_23 = arith.constant dense<0.000000e+00> : vector<2x8xf32>
    %31 = vector.multi_reduction <add>, %30, %cst_23 [2] : vector<2x8x128xf32> to vector<2x8xf32>
    %32 = vector.shape_cast %31 : vector<2x8xf32> to vector<2x8x1xf32>
    %33 = tpu.reciprocal %32 {approx = true} : vector<2x8x1xf32> -> vector<2x8x1xf32>
    %34 = vector.broadcast %33 : vector<2x8x1xf32> to vector<2x8x128xf32>
    %35 = arith.mulf %30, %34 : vector<2x8x128xf32>
    %c0_24 = arith.constant 0 : index
    %c0_25 = arith.constant 0 : index
    %c0_26 = arith.constant 0 : index
    %36 = vector.load %arg9[%c0_24, %c0_25, %c0_26] : memref<2x8x128xf32, #tpu.memory_space<vmem>>, vector<2x8x128xf32>
    tpu.vector_store %arg9[%c0_24, %c0_25, %c0_26], %35 {strides = array<i32>} : memref<2x8x128xf32, #tpu.memory_space<vmem>>, vector<2x8x128xf32>,
    %37 = arith.truncf %35 : vector<2x8x128xf32> to vector<2x8x128xbf16>
    %38 = arith.truncf %14 : vector<2x128x128xf32> to vector<2x128x128xbf16>
    "tpu.trace_start"() <{level = 10 : i32, message = "bqk,bko->bqo"}> : () -> ()
    %cst_27 = arith.constant dense<0.000000e+00> : vector<2x8x128xf32>
    %39 = tpu.matmul %37, %38, %cst_27 {dimension_numbers = #tpu.dot_dimension_numbers<[2], [1], [1], [2], [0, 0, 0, 1, 1, 2], [0], [0]>} : vector<2x8x128xbf16>, vector<2x128x128xbf16>, vector<2x8x128xf32> -> vector<2x8x128xf32>
    "tpu.trace_stop"() : () -> ()
    %c0_28 = arith.constant 0 : index
    %c0_29 = arith.constant 0 : index
    %c0_30 = arith.constant 0 : index
    %40 = vector.load %arg8[%c0_28, %c0_29, %c0_30] : memref<2x8x128xf32, #tpu.memory_space<vmem>>, vector<2x8x128xf32>
    tpu.vector_store %arg8[%c0_28, %c0_29, %c0_30], %39 {strides = array<i32>} : memref<2x8x128xf32, #tpu.memory_space<vmem>>, vector<2x8x128xf32>,
    return
  }
  func.func @transform_0(%arg0: i32) -> (i32, i32, i32) {
    %c0_i32 = arith.constant 0 : i32
    %c0_i32_0 = arith.constant 0 : i32
    %c0_i32_1 = arith.constant 0 : i32
    return %arg0, %c0_i32, %c0_i32_0 : i32, i32, i32
  }
  func.func @transform_1(%arg0: i32) -> (i32, i32, i32) {
    %c0_i32 = arith.constant 0 : i32
    %c0_i32_0 = arith.constant 0 : i32
    %c0_i32_1 = arith.constant 0 : i32
    return %arg0, %c0_i32, %c0_i32_0 : i32, i32, i32
  }
  func.func @transform_2(%arg0: i32) -> (i32, i32, i32) {
    %c0_i32 = arith.constant 0 : i32
    %c0_i32_0 = arith.constant 0 : i32
    %c0_i32_1 = arith.constant 0 : i32
    return %arg0, %c0_i32, %c0_i32_0 : i32, i32, i32
  }
  func.func @transform_3(%arg0: i32) -> (i32, i32, i32) {
    %c0_i32 = arith.constant 0 : i32
    %c0_i32_0 = arith.constant 0 : i32
    %c0_i32_1 = arith.constant 0 : i32
    return %arg0, %c0_i32, %c0_i32_0 : i32, i32, i32
  }
  func.func @transform_4(%arg0: i32) -> (i32, i32) {
    %c0_i32 = arith.constant 0 : i32
    %c0_i32_0 = arith.constant 0 : i32
    %c0_i32_1 = arith.constant 0 : i32
    return %c0_i32, %c0_i32_0 : i32, i32
  }
  func.func @transform_5(%arg0: i32) -> (i32, i32) {
    %c0_i32 = arith.constant 0 : i32
    %c0_i32_0 = arith.constant 0 : i32
    %c0_i32_1 = arith.constant 0 : i32
    return %c0_i32, %c0_i32_0 : i32, i32
  }
  func.func @transform_6(%arg0: i32) -> (i32, i32) {
    %c0_i32 = arith.constant 0 : i32
    %c0_i32_0 = arith.constant 0 : i32
    %c0_i32_1 = arith.constant 0 : i32
    return %c0_i32, %c0_i32_0 : i32, i32
  }
  func.func @transform_7(%arg0: i32) -> (i32, i32, i32) {
    %c0_i32 = arith.constant 0 : i32
    %c0_i32_0 = arith.constant 0 : i32
    %c0_i32_1 = arith.constant 0 : i32
    return %arg0, %c0_i32, %c0_i32_0 : i32, i32, i32
  }
  func.func @transform_8(%arg0: i32) -> (i32, i32, i32) {
    %c0_i32 = arith.constant 0 : i32
    %c0_i32_0 = arith.constant 0 : i32
    %c0_i32_1 = arith.constant 0 : i32
    return %arg0, %c0_i32, %c0_i32_0 : i32, i32, i32
  }
}

</mosaic_0001>

<bundles_post_ra>
// kernel: tpu_custom_call.1
= control target key start
LH: loop header
LB: loop body
LE: loop exit
PB: predicated region body
PF: predicated region fallthrough
CT: control target
= control target key end

     0   :  { %14 = vsyncpa [#allocation3], 0  ;;  %vm46_vm0 = vcmask 130048   ;;  %vm237_vm1 = vcmask 1043456   ;;  %s1574_s0 = inlined_call_operand.vmem [shape: s32[2,8,1], index: 0, kind: input, shape index: {}]   ;;  %s1575_s1 = inlined_call_operand.vmem [shape: bf16[2,8,16], index: 1, kind: input, shape index: {}]   ;;  %s1576_s2 = inlined_call_operand.vmem [shape: bf16[2,128,24], index: 2, kind: input, shape index: {}]   ;;  %s1577_s3 = inlined_call_operand.vmem [shape: bf16[2,128,40], index: 3, kind: input, shape index: {}]   ;;  %s1578_s4 = inlined_call_operand.vmem [shape: bf16[16,128], index: 4, kind: input, shape index: {}]   ;;  %s1579_s5 = inlined_call_operand.vmem [shape: bf16[24,128], index: 5, kind: input, shape index: {}]   ;;  %s1580_s6 = inlined_call_operand.vmem [shape: bf16[40,128], index: 6, kind: input, shape index: {}]   ;;  %s1581_s7 = inlined_call_operand.hbm [shape: f32[2,8,128], index: 7, kind: output, shape index: {0}]   ;;  %s1582_s8 = inlined_call_operand.hbm [shape: f32[2,8,128], index: 8, kind: output, shape index: {1}]  }
   0x1   :  { %v1171_v0 = vld [vmem:[%s1578_s4] sm:$0xff]  ;;  %v98_v1 = vld [vmem:[%s1579_s5 + $0x8] sm:$0xf] }
   0x2   :  { %v1170_v2 = vld [vmem:[%s1575_s1] sm:$0xff]  ;;  %v184_v3 = vunpack.c.l.b16 %v98_v1  ;;  %57 = vmatpush.bf16.msra.mxu0 %v1171_v0 }
   0x3   :  { %15 = vsyncpa [#allocation5], 0  ;;  %v1188_v6 = vld [vmem:[%s1579_s5] sm:$0xff]  ;;  %v1178_v7 = vld [vmem:[%s1576_s2 + $0x30] sm:$0xff]  ;;  %vm188_vm2 = vcmask 195584   ;;  %vm462_vm3 = vcmask 326656  }
   0x4   :  { %v186_v4 = vpack.c.b16 %v184_v3, %v184_v3  ;;  %v1172_v8 = vld [vmem:[%s1576_s2] sm:$0xff]  ;;  %v1179_v9 = vld [vmem:[%s1576_s2 + $0x38] sm:$0xff]  ;;  %v1173_v10 = vld [vmem:[%s1576_s2 + $0x8] sm:$0xff]  ;;  %s972_s10 = sshll.u32 %s1582_s8, 4  ;;  %s1280_s11 = smov 128   ;;  %s973_s10 = int_to_ptr.hbm [resolvable:$true] %s972_s10 }
   0x5   :  { %997 = vmatmul.msk.bf16.vlgmr.msra.gmra.mxu0 %vm46_vm0, %v1170_v2  ;;  %v1180_v11 = vld [vmem:[%s1576_s2 + $0x40] sm:$0xff]  ;;  %v1174_v12 = vld [vmem:[%s1576_s2 + $0x10] sm:$0xff]  ;;  %v1181_v13 = vld [vmem:[%s1576_s2 + $0x48] sm:$0xff]  ;;  %s1281_s4 = smov 8   ;;  %s1282_s12 = smov [#allocation2]  }
   0x6   :  { %v239_v5 = vsel %vm237_vm1, %v186_v4, 0  ;;  %v1175_v14 = vld [vmem:[%s1576_s2 + $0x18] sm:$0xff]  ;;  %v1182_v15 = vld [vmem:[%s1576_s2 + $0x50] sm:$0xff]  ;;  %v1176_v16 = vld [vmem:[%s1576_s2 + $0x20] sm:$0xff]  ;;  %s957_s13 = sshll.u32 %s1282_s12, 4  ;;  %s959_s15 = sshll.u32 %s1581_s7, 4  ;;  %s958_s13 = int_to_ptr.vmem [resolvable:$true] %s957_s13  ;;  %s960_s15 = int_to_ptr.hbm [resolvable:$true] %s959_s15 }
   0x7   :  { %1207 = vmatpush.bf16.msra.mxu1 %v239_v5  ;;  %247 = vmatpush.bf16.msrb.mxu0 %v239_v5  ;;  %v1183_v17 = vld [vmem:[%s1576_s2 + $0x58] sm:$0xff]  ;;  %v1177_v18 = vld [vmem:[%s1576_s2 + $0x28] sm:$0xff]  ;;  %v1184_v19 = vld [vmem:[%s1576_s2 + $0x60] sm:$0xff] }
   0x8   :  { %v1185_v20 = vld [vmem:[%s1576_s2 + $0x68] sm:$0xff]  ;;  %v366_v21 = vld [vmem:[%s1580_s6 + $0x10] sm:$0xf]  ;;  %v1205_v27 = vld [vmem:[%s1580_s6] sm:$0xff] }
   0x9   :  { %v456_v22 = vunpack.c.l.b16 %v366_v21  ;;  %v1206_v26 = vld [vmem:[%s1580_s6 + $0x8] sm:$0xff]  ;;  %v1186_v28 = vld [vmem:[%s1576_s2 + $0x70] sm:$0xff]  ;;  %v1200_v31 = vld [vmem:[%s1577_s3 + $0x58] sm:$0xff] }
   0xa   :  { %v1187_v34 = vld [vmem:[%s1576_s2 + $0x78] sm:$0xff]  ;;  %v1201_v37 = vld [vmem:[%s1577_s3 + $0x60] sm:$0xff]  ;;  %v1202_v56 = vld [vmem:[%s1577_s3 + $0x68] sm:$0xff] }
   0xb   :  { %1208 = vmatpush.bf16.msra.mxu1 %v1188_v6  ;;  %248 = vmatpush.bf16.msrb.mxu0 %v1188_v6  ;;  %v459_v23 = vpack.c.b16 %v456_v22, %v456_v22  ;;  %v1204_v22 = vld [vmem:[%s1577_s3 + $0x78] sm:$0xff] }
   0xd   :  { %v512_v24 = vsel %vm237_vm1, %v459_v23, 0 }
   0xe   :  { %1072 = vmatmul.msk.bf16.vlgmr.msra.gmra.mxu1 %vm188_vm2, %v1178_v7  ;;  %1209 = vmatpush.bf16.msra.mxu3 %v512_v24  ;;  %v1203_v7 = vld [vmem:[%s1577_s3 + $0x70] sm:$0xff] }
   0xf   :  { %519 = vmatpush.bf16.msra.mxu2 %v512_v24 }
  0x12   :  { %1210 = vmatpush.bf16.msra.mxu3 %v1206_v26 }
  0x13   :  { %520 = vmatpush.bf16.msra.mxu2 %v1206_v26 }
  0x15   :  { %1066 = vmatmul.msk.bf16.vlgmr.msrb.gmra.mxu0 %vm188_vm2, %v1172_v8 }
  0x16   :  { %1211 = vmatpush.bf16.msra.mxu3 %v1205_v27 }
  0x17   :  { %521 = vmatpush.bf16.msra.mxu2 %v1205_v27 }
  0x19   :  { %1165 = vmatmul.msk.bf16.vlgmr.msra.gmra.mxu3 %vm462_vm3, %v1200_v31 }
  0x1e   :  { %1073 = vmatmul.msk.bf16.gmra.mxu1 %vm188_vm2, %v1179_v9 }
  0x25   :  { %1067 = vmatmul.msk.bf16.gmra.mxu0 %vm188_vm2, %v1173_v10 }
  0x29   :  { %1166 = vmatmul.msk.bf16.gmra.mxu3 %vm462_vm3, %v1201_v37 }
  0x2e   :  { %1074 = vmatmul.msk.bf16.gmra.mxu1 %vm188_vm2, %v1180_v11 }
  0x35   :  { %1068 = vmatmul.msk.bf16.gmra.mxu0 %vm188_vm2, %v1174_v12 }
  0x39   :  { %1167 = vmatmul.msk.bf16.gmra.mxu3 %vm462_vm3, %v1202_v56 }
  0x3e   :  { %1075 = vmatmul.msk.bf16.gmra.mxu1 %vm188_vm2, %v1181_v13 }
  0x45   :  { %1069 = vmatmul.msk.bf16.gmra.mxu0 %vm188_vm2, %v1175_v14 }
  0x49   :  { %1168 = vmatmul.msk.bf16.gmra.mxu3 %vm462_vm3, %v1203_v7 }
  0x4e   :  { %1076 = vmatmul.msk.bf16.gmra.mxu1 %vm188_vm2, %v1182_v15 }
  0x55   :  { %1070 = vmatmul.msk.bf16.gmra.mxu0 %vm188_vm2, %v1176_v16 }
  0x59   :  { %1169 = vmatmul.msk.bf16.gmra.mxu3 %vm462_vm3, %v1204_v22 }
  0x5e   :  { %1077 = vmatmul.msk.bf16.gmra.mxu1 %vm188_vm2, %v1183_v17 }
  0x65   :  { %1071 = vmatmul.msk.bf16.gmra.mxu0 %vm188_vm2, %v1177_v18 }
  0x6e   :  { %1078 = vmatmul.msk.bf16.gmra.mxu1 %vm188_vm2, %v1184_v19 }
  0x7e   :  { %1079 = vmatmul.msk.bf16.gmra.mxu1 %vm188_vm2, %v1185_v20 }
  0x82   :  { %v1401_v25 = vpop.f32.mrf.mxu0 }
  0x8a   :  { %v1412_v30 = vpop.f32.mrf.mxu0 }
  0x8b   :  { %v280_v29 = vpop.f32.mrf.mxu1 }
  0x8c   :  { %v617_v46 = vpack.c.bf16 %v280_v29, %v280_v29 }
  0x8e   :  { %1080 = vmatmul.msk.bf16.gmra.mxu1 %vm188_vm2, %v1186_v28  ;;  %v665_v52 = vunpack.c.l.b16 %v617_v46 }
  0x92   :  { %v250_v33 = vpop.f32.mrf.mxu0 }
  0x93   :  { %v282_v32 = vpop.f32.mrf.mxu1  ;;  %v605_v47 = vpack.c.bf16 %v250_v33, %v250_v33 }
  0x94   :  { %v618_v44 = vpack.c.bf16 %v282_v32, %v282_v32 }
  0x95   :  { %v1427_v53 = vunpack.c.l.b16 %v605_v47 }
  0x96   :  { %v666_v51 = vunpack.c.l.b16 %v618_v44 }
  0x98   :  { %v675_v55 = vpack.c.b16 %v666_v51, %v665_v52 }
  0x9a   :  { %v252_v36 = vpop.f32.mrf.mxu0 }
  0x9b   :  { %v285_v35 = vpop.f32.mrf.mxu1  ;;  %v606_v48 = vpack.c.bf16 %v252_v36, %v252_v36 }
  0x9c   :  { %v619_v38 = vpack.c.bf16 %v285_v35, %v285_v35  ;;  %v578_v22 = vpop.f32.mrf.mxu3 }
  0x9d   :  { %v1429_v54 = vunpack.c.l.b16 %v606_v48 }
  0x9e   :  { %1081 = vmatmul.msk.bf16.gmra.mxu1 %vm188_vm2, %v1187_v34  ;;  %v667_v42 = vunpack.c.l.b16 %v619_v38 }
  0x9f   :  { %v669_v58 = vpack.c.b16 %v1429_v54, %v1427_v53 }
  0xa2   :  { %v255_v40 = vpop.f32.mrf.mxu0 }
  0xa3   :  { %v287_v39 = vpop.f32.mrf.mxu1  ;;  %v607_v1 = vpack.c.bf16 %v255_v40, %v255_v40 }
  0xa4   :  { %v620_v41 = vpack.c.bf16 %v287_v39, %v287_v39 }
  0xa5   :  { %v1443_v5 = vunpack.c.l.b16 %v607_v1 }
  0xa6   :  { %v668_v43 = vunpack.c.l.b16 %v620_v41 }
  0xa8   :  { %v676_v45 = vpack.c.b16 %v668_v43, %v667_v42 }
  0xaa   :  { %685 = vmatpush.bf16.xpose.msrb.mxu3 %v676_v45  ;;  %v257_v50 = vpop.f32.mrf.mxu0 }
  0xab   :  { %v290_v49 = vpop.f32.mrf.mxu1  ;;  %v608_v2 = vpack.c.bf16 %v257_v50, %v257_v50 }
  0xac   :  { %v621_v57 = vpack.c.bf16 %v290_v49, %v290_v49 }
  0xad   :  { %v1445_v6 = vunpack.c.l.b16 %v608_v2 }
  0xae   :  { %v1437_v62 = vunpack.c.l.b16 %v621_v57 }
  0xaf   :  { %v670_v9 = vpack.c.b16 %v1445_v6, %v1443_v5  ;;  %v580_v6 = vpop.f32.mrf.mxu3 }
  0xb2   :  { %686 = vmatpush.bf16.xpose.msrb.mxu3 %v675_v55  ;;  %v260_v60 = vpop.f32.mrf.mxu0 }
  0xb3   :  { %v292_v59 = vpop.f32.mrf.mxu1  ;;  %v609_v16 = vpack.c.bf16 %v260_v60, %v260_v60  ;;  %v1189_v60 = vld [vmem:[%s1577_s3] sm:$0xff] }
  0xb4   :  { %v622_v61 = vpack.c.bf16 %v292_v59, %v292_v59  ;;  %1154 = vmatmul.msk.bf16.vlgmr.msra.gmra.mxu2 %vm462_vm3, %v1189_v60 }
  0xb5   :  { %v657_v20 = vunpack.c.l.b16 %v609_v16 }
  0xb6   :  { %v1439_v63 = vunpack.c.l.b16 %v622_v61 }
  0xb8   :  { %v730_v0 = vpack.c.b16 %v1439_v63, %v1437_v62 }
  0xba   :  { %v262_v4 = vpop.f32.mrf.mxu0 }
  0xbb   :  { %v295_v3 = vpop.f32.mrf.mxu1  ;;  %v610_v17 = vpack.c.bf16 %v262_v4, %v262_v4 }
  0xbc   :  { %v623_v8 = vpack.c.bf16 %v295_v3, %v295_v3 }
  0xbd   :  { %v658_v21 = vunpack.c.l.b16 %v610_v17 }
  0xbe   :  { %v1453_v13 = vunpack.c.l.b16 %v623_v8 }
  0xbf   :  { %v671_v24 = vpack.c.b16 %v658_v21, %v657_v20  ;;  %v1191_v21 = vld [vmem:[%s1577_s3 + $0x10] sm:$0xff] }
  0xc2   :  { %v265_v11 = vpop.f32.mrf.mxu0 }
  0xc3   :  { %v297_v10 = vpop.f32.mrf.mxu1  ;;  %v611_v59 = vpack.c.bf16 %v265_v11, %v265_v11  ;;  %v1190_v11 = vld [vmem:[%s1577_s3 + $0x8] sm:$0xff] }
  0xc4   :  { %v624_v12 = vpack.c.bf16 %v297_v10, %v297_v10  ;;  %1155 = vmatmul.msk.bf16.gmra.mxu2 %vm462_vm3, %v1190_v11 }
  0xc5   :  { %v659_v7 = vunpack.c.l.b16 %v611_v59  ;;  %v764_v59 = vld [vmem:[%s1574_s0 + $0x8] sm:$0xff] }
  0xc6   :  { %v1455_v14 = vunpack.c.l.b16 %v624_v12 }
  0xc8   :  { %v731_v15 = vpack.c.b16 %v1455_v14, %v1453_v13  ;;  %v1196_v13 = vld [vmem:[%s1577_s3 + $0x38] sm:$0xff] }
  0xca   :  { %v267_v19 = vpop.f32.mrf.mxu0 }
  0xcb   :  { %v300_v18 = vpop.f32.mrf.mxu1  ;;  %v612_v61 = vpack.c.bf16 %v267_v19, %v267_v19  ;;  %v763_v19 = vld [vmem:[%s1574_s0] sm:$0xff] }
  0xcc   :  { %v625_v23 = vpack.c.bf16 %v300_v18, %v300_v18  ;;  %v1278_v18 = vmov 0  }
  0xcd   :  { %v660_v8 = vunpack.c.l.b16 %v612_v61  ;;  %1217 = vset.pattern.permute.xlu0 %v1278_v18  ;;  %v1195_v61 = vld [vmem:[%s1577_s3 + $0x30] sm:$0xff] }
  0xce   :  { %v1463_v29 = vunpack.c.l.b16 %v625_v23  ;;  %766 = vperm.xlu0 %1217, %v763_v19  }
  0xcf   :  { %v672_v12 = vpack.c.b16 %v660_v8, %v659_v7 }
  0xd2   :  { %v270_v27 = vpop.f32.mrf.mxu0 }
  0xd3   :  { %v302_v26 = vpop.f32.mrf.mxu1  ;;  %v613_v47 = vpack.c.bf16 %v270_v27, %v270_v27  ;;  %v1192_v27 = vld [vmem:[%s1577_s3 + $0x18] sm:$0xff] }
  0xd4   :  { %v626_v28 = vpack.c.bf16 %v302_v26, %v302_v26  ;;  %1156 = vmatmul.msk.bf16.gmra.mxu2 %vm462_vm3, %v1191_v21 }
  0xd5   :  { %v661_v51 = vunpack.c.l.b16 %v613_v47 }
  0xd6   :  { %v1465_v31 = vunpack.c.l.b16 %v626_v28  ;;  %769 = vperm.xlu0 %1217, %v764_v59  }
  0xd8   :  { %v732_v32 = vpack.c.b16 %v1465_v31, %v1463_v29 }
  0xda   :  { %v272_v34 = vpop.f32.mrf.mxu0 }
  0xdb   :  { %v305_v33 = vpop.f32.mrf.mxu1  ;;  %v614_v48 = vpack.c.bf16 %v272_v34, %v272_v34  ;;  %v583_v34 = vpop.f32.mrf.mxu3 }
  0xdc   :  { %v627_v35 = vpack.c.bf16 %v305_v33, %v305_v33 }
  0xdd   :  { %v662_v52 = vunpack.c.l.b16 %v614_v48 }
  0xde   :  { %v1469_v39 = vunpack.c.l.b16 %v627_v35 }
  0xdf   :  { %v673_v3 = vpack.c.b16 %v662_v52, %v661_v51 }
  0xe2   :  { %v275_v37 = vpop.f32.mrf.mxu0 }
  0xe3   :  { %v307_v36 = vpop.f32.mrf.mxu1  ;;  %v615_v42 = vpack.c.bf16 %v275_v37, %v275_v37 }
  0xe4   :  { %v628_v38 = vpack.c.bf16 %v307_v36, %v307_v36  ;;  %1157 = vmatmul.msk.bf16.gmra.mxu2 %vm462_vm3, %v1192_v27 }
  0xe5   :  { %v663_v45 = vunpack.c.l.b16 %v615_v42 }
  0xe6   :  { %v1471_v40 = vunpack.c.l.b16 %v628_v38 }
  0xe8   :  { %v733_v41 = vpack.c.b16 %v1471_v40, %v1469_v39 }
  0xea   :  { %v277_v44 = vpop.f32.mrf.mxu0 }
  0xeb   :  { %v310_v43 = vpop.f32.mrf.mxu1  ;;  %v616_v46 = vpack.c.bf16 %v277_v44, %v277_v44  ;;  %v1193_v44 = vld [vmem:[%s1577_s3 + $0x20] sm:$0xff] }
  0xec   :  { %v629_v55 = vpack.c.bf16 %v310_v43, %v310_v43 }
  0xed   :  { %v664_v49 = vunpack.c.l.b16 %v616_v46  ;;  %v819_v46 = vpack.c.bf16 %v578_v22, %v578_v22 }
  0xee   :  { %v722_v1 = vunpack.c.l.b16 %v629_v55 }
  0xef   :  { %v674_v50 = vpack.c.b16 %v664_v49, %v663_v45  ;;  %v912_v49 = vunpack.c.l.b16 %v819_v46 }
  0xf1   :  { %687 = vmatpush.bf16.xpose.msrb.mxu3 %v674_v50  ;;  %v820_v50 = vpack.c.bf16 %v580_v6, %v580_v6 }
  0xf3   :  { %v312_v56 = vpop.f32.mrf.mxu1  ;;  %v913_v51 = vunpack.c.l.b16 %v820_v50 }
  0xf4   :  { %v630_v57 = vpack.c.bf16 %v312_v56, %v312_v56  ;;  %1158 = vmatmul.msk.bf16.gmra.mxu2 %vm462_vm3, %v1193_v44  ;;  %v1194_v56 = vld [vmem:[%s1577_s3 + $0x28] sm:$0xff] }
  0xf5   :  { %v925_v52 = vpack.c.b16 %v913_v51, %v912_v49 }
  0xf6   :  { %v723_v2 = vunpack.c.l.b16 %v630_v57 }
  0xf8   :  { %v734_v4 = vpack.c.b16 %v723_v2, %v722_v1 }
  0xf9   :  { %688 = vmatpush.bf16.xpose.msrb.mxu3 %v673_v3 }
  0xfb   :  { %v315_v10 = vpop.f32.mrf.mxu1 }
  0xfc   :  { %v631_v42 = vpack.c.bf16 %v315_v10, %v315_v10 }
  0xfe   :  { %v724_v45 = vunpack.c.l.b16 %v631_v42 }
 0x101   :  { %689 = vmatpush.bf16.xpose.msrb.mxu3 %v672_v12  ;;  %v821_v12 = vpack.c.bf16 %v583_v34, %v583_v34 }
 0x103   :  { %v317_v16 = vpop.f32.mrf.mxu1  ;;  %v914_v62 = vunpack.c.l.b16 %v821_v12 }
 0x104   :  { %v632_v37 = vpack.c.bf16 %v317_v16, %v317_v16  ;;  %1159 = vmatmul.msk.bf16.gmra.mxu2 %vm462_vm3, %v1194_v56 }
 0x106   :  { %v725_v43 = vunpack.c.l.b16 %v632_v37 }
 0x108   :  { %v735_v48 = vpack.c.b16 %v725_v43, %v724_v45 }
 0x109   :  { %690 = vmatpush.bf16.xpose.msrb.mxu3 %v671_v24 }
 0x10b   :  { %v320_v17 = vpop.f32.mrf.mxu1 }
 0x111   :  { %691 = vmatpush.bf16.xpose.msrb.mxu3 %v670_v9  ;;  %v603_v9 = vpack.c.bf16 %v1401_v25, %v1401_v25  ;;  %v585_v25 = vpop.f32.mrf.mxu3 }
 0x112   :  { %v822_v14 = vpack.c.bf16 %v585_v25, %v585_v25 }
 0x113   :  { %v322_v20 = vpop.f32.mrf.mxu1 }
 0x114   :  { %v634_v53 = vpack.c.bf16 %v322_v20, %v322_v20  ;;  %1160 = vmatmul.msk.bf16.gmra.mxu2 %vm462_vm3, %v1195_v61  ;;  %v915_v63 = vunpack.c.l.b16 %v822_v14 }
 0x116   :  { %v727_v35 = vunpack.c.l.b16 %v634_v53  ;;  %v926_v18 = vpack.c.b16 %v915_v63, %v914_v62  ;;  %v761_v53 = vlaneseq }
 0x119   :  { %692 = vmatpush.bf16.xpose.msrb.mxu3 %v669_v58  ;;  %v633_v58 = vpack.c.bf16 %v320_v17, %v320_v17  ;;  %v588_v47 = vpop.f32.mrf.mxu3  ;;  %v604_v17 = vpack.c.bf16 %v1412_v30, %v1412_v30 }
 0x11a   :  { %v823_v29 = vpack.c.bf16 %v588_v47, %v588_v47 }
 0x11b   :  { %v325_v5 = vpop.f32.mrf.mxu1  ;;  %v726_v36 = vunpack.c.l.b16 %v633_v58  ;;  %v762_v58 = vand.u32 127, %v761_v53 }
 0x11c   :  { %v635_v23 = vpack.c.bf16 %v325_v5, %v325_v5 }
 0x11d   :  { %v736_v38 = vpack.c.b16 %v727_v35, %v726_v36 }
 0x11e   :  { %v728_v28 = vunpack.c.l.b16 %v635_v23 }
 0x120   :  { %693 = vmatmul.bf16.vlgmr.msrb.gmra.mxu3 %v603_v9 }
 0x121   :  { %v590_v55 = vpop.f32.mrf.mxu3 }
 0x122   :  { %v824_v31 = vpack.c.bf16 %v590_v55, %v590_v55 }
 0x123   :  { %v327_v24 = vpop.f32.mrf.mxu1 }
 0x124   :  { %v636_v26 = vpack.c.bf16 %v327_v24, %v327_v24  ;;  %v917_v16 = vunpack.c.l.b16 %v824_v31  ;;  %1161 = vmatmul.msk.bf16.gmra.mxu2 %vm462_vm3, %v1196_v13 }
 0x126   :  { %v729_v33 = vunpack.c.l.b16 %v636_v26 }
 0x128   :  { %v737_v54 = vpack.c.b16 %v729_v33, %v728_v28 }
 0x129   :  { %v593_v57 = vpop.f32.mrf.mxu3 }
 0x12a   :  { %746 = vmatpush.bf16.xpose.msra.mxu0 %v737_v54  ;;  %v825_v39 = vpack.c.bf16 %v593_v57, %v593_v57  ;;  %v1197_v57 = vld [vmem:[%s1577_s3 + $0x40] sm:$0xff] }
 0x131   :  { %v595_v60 = vpop.f32.mrf.mxu3 }
 0x132   :  { %747 = vmatpush.bf16.xpose.msra.mxu0 %v736_v38  ;;  %v826_v40 = vpack.c.bf16 %v595_v60, %v595_v60 }
 0x134   :  { %v919_v8 = vunpack.c.l.b16 %v826_v40  ;;  %1162 = vmatmul.msk.bf16.gmra.mxu2 %vm462_vm3, %v1197_v57 }
 0x137   :  { %v523_v19 = vpop.f32.mrf.mxu2 }
 0x138   :  { %v797_v22 = vpack.c.bf16 %v523_v19, %v523_v19 }
 0x139   :  { %v598_v1 = vpop.f32.mrf.mxu3 }
 0x13a   :  { %748 = vmatpush.bf16.xpose.msra.mxu0 %v735_v48  ;;  %v827_v2 = vpack.c.bf16 %v598_v1, %v598_v1  ;;  %v1535_v6 = vunpack.c.l.b16 %v797_v22 }
 0x13c   :  { %v920_v3 = vunpack.c.l.b16 %v827_v2 }
 0x13f   :  { %v525_v20 = vpop.f32.mrf.mxu2 }
 0x140   :  { %v798_v5 = vpack.c.bf16 %v525_v20, %v525_v20  ;;  %v767_v35 = vpop.permute.xlu0 %766  ;;  %v1199_v20 = vld [vmem:[%s1577_s3 + $0x50] sm:$0xff] }
 0x141   :  { %vm771_vm4 = vcmp.lt.s32.totalorder %v762_v58, %v767_v35 }
 0x142   :  { %749 = vmatpush.bf16.xpose.msra.mxu0 %v734_v4  ;;  %v1537_v9 = vunpack.c.l.b16 %v798_v5 }
 0x144   :  { %v861_v23 = vpack.c.b16 %v1537_v9, %v1535_v6 }
 0x147   :  { %v528_v21 = vpop.f32.mrf.mxu2 }
 0x148   :  { %v799_v30 = vpack.c.bf16 %v528_v21, %v528_v21 }
 0x14a   :  { %750 = vmatpush.bf16.xpose.msra.mxu0 %v733_v41  ;;  %v600_v41 = vpop.f32.mrf.mxu3  ;;  %v1541_v26 = vunpack.c.l.b16 %v799_v30 }
 0x14b   :  { %v828_v4 = vpack.c.bf16 %v600_v41, %v600_v41 }
 0x14d   :  { %v921_v7 = vunpack.c.l.b16 %v828_v4  ;;  %v1198_v4 = vld [vmem:[%s1577_s3 + $0x48] sm:$0xff]  ;;  %s1279_s3 = smov [#allocation4]  }
 0x14e   :  { %1163 = vmatmul.msk.bf16.gmra.mxu2 %vm462_vm3, %v1198_v4  ;;  %s970_s29 = sshll.u32 %s1279_s3, 4  ;;  %s971_s29 = int_to_ptr.vmem [resolvable:$true] %s970_s29 }
 0x14f   :  { %v929_v10 = vpack.c.b16 %v921_v7, %v920_v3  ;;  %v530_v24 = vpop.f32.mrf.mxu2 }
 0x150   :  { %v800_v27 = vpack.c.bf16 %v530_v24, %v530_v24 }
 0x152   :  { %751 = vmatpush.bf16.xpose.msra.mxu0 %v732_v32  ;;  %v918_v32 = vunpack.c.l.b16 %v825_v39  ;;  %v1543_v28 = vunpack.c.l.b16 %v800_v27  ;;  %v770_v39 = vpop.permute.xlu0 %769 }
 0x153   :  { %vm772_vm5 = vcmp.lt.s32.totalorder %v762_v58, %v770_v39 }
 0x154   :  { %v928_v11 = vpack.c.b16 %v919_v8, %v918_v32  ;;  %v862_v33 = vpack.c.b16 %v1543_v28, %v1541_v26 }
 0x157   :  { %v533_v34 = vpop.f32.mrf.mxu2 }
 0x158   :  { %v801_v54 = vpack.c.bf16 %v533_v34, %v533_v34 }
 0x15a   :  { %752 = vmatpush.bf16.xpose.msra.mxu0 %v731_v15  ;;  %v916_v15 = vunpack.c.l.b16 %v823_v29  ;;  %v1547_v25 = vunpack.c.l.b16 %v801_v54 }
 0x15e   :  { %1164 = vmatmul.msk.bf16.gmra.mxu2 %vm462_vm3, %v1199_v20 }
 0x15f   :  { %v535_v36 = vpop.f32.mrf.mxu2 }
 0x160   :  { %v802_v37 = vpack.c.bf16 %v535_v36, %v535_v36 }
 0x162   :  { %753 = vmatpush.bf16.xpose.msra.mxu0 %v730_v0  ;;  %v927_v0 = vpack.c.b16 %v917_v16, %v916_v15  ;;  %v850_v43 = vunpack.c.l.b16 %v802_v37 }
 0x164   :  { %v863_v45 = vpack.c.b16 %v850_v43, %v1547_v25 }
 0x167   :  { %v538_v46 = vpop.f32.mrf.mxu2 }
 0x168   :  { %v803_v51 = vpack.c.bf16 %v538_v46, %v538_v46 }
 0x169   :  { %754 = vmatmul.bf16.vlgmr.msra.gmra.mxu0 %v604_v17 }
 0x16a   :  { %938 = vmatpush.bf16.msrb.mxu0 %v929_v10  ;;  %v851_v55 = vunpack.c.l.b16 %v803_v51 }
 0x16e   :  { %939 = vmatpush.bf16.msrb.mxu0 %v928_v11 }
 0x16f   :  { %v540_v48 = vpop.f32.mrf.mxu2 }
 0x170   :  { %v804_v56 = vpack.c.bf16 %v540_v48, %v540_v48 }
 0x172   :  { %940 = vmatpush.bf16.msrb.mxu0 %v927_v0  ;;  %v852_v59 = vunpack.c.l.b16 %v804_v56 }
 0x174   :  { %v864_v60 = vpack.c.b16 %v852_v59, %v851_v55 }
 0x176   :  { %941 = vmatpush.bf16.msrb.mxu0 %v926_v18 }
 0x177   :  { %v543_v49 = vpop.f32.mrf.mxu2 }
 0x178   :  { %v805_v62 = vpack.c.bf16 %v543_v49, %v543_v49 }
 0x17a   :  { %942 = vmatpush.bf16.msrb.mxu0 %v925_v52  ;;  %v853_v22 = vunpack.c.l.b16 %v805_v62 }
 0x17f   :  { %v545_v50 = vpop.f32.mrf.mxu2 }
 0x180   :  { %v806_v63 = vpack.c.bf16 %v545_v50, %v545_v50 }
 0x182   :  { %v854_v5 = vunpack.c.l.b16 %v806_v63 }
 0x184   :  { %v865_v24 = vpack.c.b16 %v854_v5, %v853_v22 }
 0x187   :  { %v548_v52 = vpop.f32.mrf.mxu2 }
 0x188   :  { %v807_v12 = vpack.c.bf16 %v548_v52, %v548_v52 }
 0x18a   :  { %v855_v0 = vunpack.c.l.b16 %v807_v12 }
 0x18f   :  { %v550_v61 = vpop.f32.mrf.mxu2 }
 0x190   :  { %v808_v13 = vpack.c.bf16 %v550_v61, %v550_v61 }
 0x192   :  { %v856_v18 = vunpack.c.l.b16 %v808_v13 }
 0x194   :  { %v866_v30 = vpack.c.b16 %v856_v18, %v855_v0 }
 0x197   :  { %v553_v1 = vpop.f32.mrf.mxu2 }
 0x198   :  { %v809_v32 = vpack.c.bf16 %v553_v1, %v553_v1 }
 0x19a   :  { %v857_v16 = vunpack.c.l.b16 %v809_v32 }
 0x19f   :  { %v555_v2 = vpop.f32.mrf.mxu2 }
 0x1a0   :  { %v810_v11 = vpack.c.bf16 %v555_v2, %v555_v2 }
 0x1a2   :  { %v858_v19 = vunpack.c.l.b16 %v810_v11 }
 0x1a3   :  { %v694_v38 = vpop.f32.mrf.mxu3 }
 0x1a4   :  { %v759_v42 = vmul.f32 0.17677669, %v694_v38  ;;  %v867_v21 = vpack.c.b16 %v858_v19, %v857_v16 }
 0x1a6   :  { %v773_v44 = vsel %vm771_vm4, %v759_v42, -1000000.0 }
 0x1a7   :  { %775 = vmax.xlane.f32.xlu1 %v773_v44  ;;  %v558_v7 = vpop.f32.mrf.mxu2 }
 0x1a8   :  { %v811_v8 = vpack.c.bf16 %v558_v7, %v558_v7 }
 0x1aa   :  { %v859_v14 = vunpack.c.l.b16 %v811_v8 }
 0x1ab   :  { %v696_v47 = vpop.f32.mrf.mxu3 }
 0x1af   :  { %v560_v31 = vpop.f32.mrf.mxu2 }
 0x1b0   :  { %v812_v10 = vpack.c.bf16 %v560_v31, %v560_v31 }
 0x1b2   :  { %v860_v15 = vunpack.c.l.b16 %v812_v10 }
 0x1b4   :  { %v868_v17 = vpack.c.b16 %v860_v15, %v859_v14 }
 0x1b6   :  { %877 = vmatpush.bf16.msra.mxu3 %v868_v17 }
 0x1b7   :  { %v563_v36 = vpop.f32.mrf.mxu2 }
 0x1ba   :  { %878 = vmatpush.bf16.msra.mxu3 %v867_v21 }
 0x1be   :  { %879 = vmatpush.bf16.msra.mxu3 %v866_v30 }
 0x1bf   :  { %v565_v37 = vpop.f32.mrf.mxu2 }
 0x1c2   :  { %880 = vmatpush.bf16.msra.mxu3 %v865_v24 }
 0x1c6   :  { %881 = vmatpush.bf16.msra.mxu3 %v864_v60 }
 0x1ca   :  { %882 = vmatpush.bf16.msra.mxu3 %v863_v45  ;;  %v814_v45 = vpack.c.bf16 %v565_v37, %v565_v37 }
 0x1cc   :  { %v907_v52 = vunpack.c.l.b16 %v814_v45 }
 0x1ce   :  { %883 = vmatpush.bf16.msra.mxu3 %v862_v33 }
 0x1d1   :  { %v568_v26 = vpop.f32.mrf.mxu2 }
 0x1d2   :  { %884 = vmatpush.bf16.msra.mxu3 %v861_v23  ;;  %v815_v42 = vpack.c.bf16 %v568_v26, %v568_v26 }
 0x1d4   :  { %v908_v46 = vunpack.c.l.b16 %v815_v42 }
 0x1d9   :  { %v570_v28 = vpop.f32.mrf.mxu2 }
 0x1da   :  { %v816_v6 = vpack.c.bf16 %v570_v28, %v570_v28 }
 0x1dc   :  { %v909_v47 = vunpack.c.l.b16 %v816_v6 }
 0x1de   :  { %v923_v55 = vpack.c.b16 %v909_v47, %v908_v46 }
 0x1e1   :  { %v573_v33 = vpop.f32.mrf.mxu2 }
 0x1e2   :  { %v817_v23 = vpack.c.bf16 %v573_v33, %v573_v33 }
 0x1e4   :  { %v910_v48 = vunpack.c.l.b16 %v817_v23 }
 0x1e6   :  { %v755_v40 = vpop.f32.mrf.mxu0 }
 0x1e7   :  { %v760_v41 = vmul.f32 0.17677669, %v755_v40 }
 0x1e9   :  { %v774_v3 = vsel %vm772_vm5, %v760_v41, -1000000.0  ;;  %v575_v9 = vpop.f32.mrf.mxu2 }
 0x1ea   :  { %777 = vmax.xlane.f32.xlu1 %v774_v3  ;;  %v818_v43 = vpack.c.bf16 %v575_v9, %v575_v9 }
 0x1ec   :  { %v911_v49 = vunpack.c.l.b16 %v818_v43 }
 0x1ee   :  { %v757_v29 = vpop.f32.mrf.mxu0  ;;  %v924_v50 = vpack.c.b16 %v911_v49, %v910_v48 }
 0x1f0   :  { %943 = vmatpush.bf16.msrb.mxu0 %v924_v50 }
 0x1f4   :  { %944 = vmatpush.bf16.msrb.mxu0 %v923_v55 }
 0x21a   :  { %v776_v27 = vpop.xlane.xlu1 %775 }
 0x21b   :  { %v779_v34 = vsub.f32 %v773_v44, %v776_v27  ;;  %v813_v44 = vpack.c.bf16 %v563_v36, %v563_v36 }
 0x21d   :  { %v781_v53 = vmul.f32 1.442695, %v779_v34  ;;  %v906_v51 = vunpack.c.l.b16 %v813_v44 }
 0x21f   :  { %1218 = vpow2.f32 %v781_v53  ;;  %v922_v56 = vpack.c.b16 %v907_v52, %v906_v51 }
 0x221   :  { %945 = vmatpush.bf16.msrb.mxu0 %v922_v56 }
 0x225   :  { %v1219_v54 = vpop.eup %1218 }
 0x226   :  { %785 = vadd.xlane.f32.xlu2 %v1219_v54 }
 0x25d   :  { %v778_v58 = vpop.xlane.xlu1 %777 }
 0x25e   :  { %v780_v35 = vsub.f32 %v774_v3, %v778_v58 }
 0x260   :  { %v783_v25 = vmul.f32 1.442695, %v780_v35 }
 0x262   :  { %1220 = vpow2.f32 %v783_v25 }
 0x268   :  { %v1221_v38 = vpop.eup %1220 }
 0x269   :  { %787 = vadd.xlane.f32.xlu2 %v1221_v38 }
 0x299   :  { %v786_v57 = vpop.xlane.xlu2 %785 }
 0x29a   :  { %1222 = vrcp.f32 %v786_v57 }
 0x2a0   :  { %v1223_v59 = vpop.eup %1222 }
 0x2a1   :  { %v791_v60 = vmul.f32 %v1223_v59, %v1219_v54 }
 0x2a3   :  { %793 = vst [vmem:[#allocation4] sm:$0xff] %v791_v60  ;;  %v795_v61 = vpack.c.bf16 %v791_v60, %v791_v60 }
 0x2a5   :  { %885 = vmatmul.bf16.vlgmr.msra.gmra.mxu3 %v795_v61 }
 0x2dc   :  { %v788_v1 = vpop.xlane.xlu2 %787 }
 0x2dd   :  { %1224 = vrcp.f32 %v788_v1 }
 0x2e3   :  { %v1225_v2 = vpop.eup %1224 }
 0x2e4   :  { %v792_v39 = vmul.f32 %v1225_v2, %v1221_v38 }
 0x2e6   :  { %794 = vst [vmem:[#allocation4 + $0x8] sm:$0xff] %v792_v39  ;;  %v796_v40 = vpack.c.bf16 %v792_v39, %v792_v39 }
 0x2e7   :  { %978 = dma.vmem_to_hbm [thread:$0]  %s971_s29, 256, %s973_s10, [#allocation5], %s1280_s11, %s1280_s11, %s1281_s4  }
 0x2e8   :  { %946 = vmatmul.bf16.vlgmr.msrb.gmra.mxu0 %v796_v40 }
 0x328   :  { %v886_v41 = vpop.f32.mrf.mxu3 }
 0x329   :  { %951 = vst [vmem:[#allocation2] sm:$0xff] %v886_v41 }
 0x330   :  { %v888_v3 = vpop.f32.mrf.mxu3 }
 0x365   :  { %v947_v4 = vpop.f32.mrf.mxu0 }
 0x366   :  { %952 = vst [vmem:[#allocation2 + $0x8] sm:$0xff] %v947_v4 }
 0x367   :  { %965 = dma.vmem_to_hbm [thread:$0]  %s958_s13, 256, %s960_s15, [#allocation3], %s1280_s11, %s1280_s11, %s1281_s4  }
 0x36d   :  { %v949_v7 = vpop.f32.mrf.mxu0 }
 0x36e   :  { %1274 = dma.done.wait [#allocation3], 256  }
 0x36f   :  { %1275 = vsyncadd [#allocation3], 4294967040 }
 0x370   :  { %1276 = dma.done.wait [#allocation5], 256  }
 0x371   :  { %1277 = vsyncadd [#allocation5], 4294967040 }
 0x372   :  { %987 = vsyncpa [#allocation3], 1 }
 0x373   :  { %988 = vsyncpa [#allocation5], 1 }

</bundles_post_ra>
